<compile_context>
chip_gen: v7x
topology: tpu7x:2x2x1
jax: 0.10.0
libtpu: 0.0.40
codegen_flags: <defaults>
</compile_context>

<pallas_src>
import jax
import jax.numpy as jnp
from jax.experimental import pallas as pl
from jax.experimental.pallas import tpu as pltpu

_LANES = 128
_VMEM_BUDGET = 32 * 1024 * 1024  # double-buffered logprob tile budget (safe on v7x)


def _round_up(x, m):
    return (x + m - 1) // m * m


def _nll_step_kernel(logp_ref, labels_ref, out_ref, acc_ref):
    """One (row-tile, vocab-tile) step of the masked-NLL reduction.

    logp_ref:   (tn, tv)  log-probabilities (f32 or bf16)
    labels_ref: (tn, 1)   int32 labels, pre-masked (pad rows carry -1)
    out_ref:    (tn, 1)   f32 per-row -logprob, written at the last vocab tile
    acc_ref:    (tn, 128) f32 lane-dense accumulator (VMEM scratch)
    """
    k = pl.program_id(1)

    @pl.when(k == 0)
    def _():
        acc_ref[...] = jnp.zeros_like(acc_ref)

    logp = logp_ref[...].astype(jnp.float32)          # (tn, tv)
    labels = labels_ref[...]                          # (tn, 1) int32
    tn, tv = logp.shape

    # Global vocab id of each lane in this vocab tile.
    vocab_ids = k * tv + jax.lax.broadcasted_iota(jnp.int32, (tn, tv), 1)
    # One-hot select; padded rows (label == -1) and padded vocab lanes never match.
    sel = jnp.where(vocab_ids == labels, logp, 0.0)   # (tn, tv)

    # Fold 128-lane vocab chunks into the lane-dense accumulator with VPU adds.
    acc = acc_ref[...]
    for j in range(tv // _LANES):
        acc = acc + sel[:, j * _LANES:(j + 1) * _LANES]
    acc_ref[...] = acc

    @pl.when(k == pl.num_programs(1) - 1)
    def _():
        # Single cross-lane reduce per row tile (once, not per vocab step).
        out_ref[...] = -jnp.sum(acc_ref[...], axis=-1, keepdims=True)


def nll_step(logprobs, labels, *, pad_id=0, tn=None, tv=None):
    """sum_{b,t} -logprobs[b,t,labels[b,t]] masked on labels != pad_id (Pallas)."""
    B, T, V = logprobs.shape
    N = B * T
    dtype = logprobs.dtype
    dsize = jnp.dtype(dtype).itemsize

    # Tiny-vocab fallback: a (tn, V<128) block wastes most of each vreg's 128
    # lanes, so the pure-JAX path is both simpler and faster there.
    if V < _LANES and tn is None and tv is None:
        mask = (labels != pad_id).astype(jnp.float32)
        picked = jnp.take_along_axis(
            logprobs.astype(jnp.float32), labels.astype(jnp.int32)[..., None], axis=-1
        )[..., 0]
        return -jnp.sum(picked * mask)

    row_align = 16 if dsize < 4 else 8  # bf16 sublane packing needs 16-row tiles

    # ---- vocab tiling: keep the whole vocab in one tile whenever an
    # 8/16-row double-buffered block still fits the budget; otherwise tile.
    V_pad = _round_up(V, _LANES)
    if tv is None:
        if 2 * row_align * V_pad * dsize <= _VMEM_BUDGET:
            tv = V_pad
        else:
            tv = max(_LANES,
                     (_VMEM_BUDGET // (2 * row_align * dsize)) // _LANES * _LANES)
    assert tv % _LANES == 0
    V_pad = _round_up(V_pad, tv)

    # ---- row tiling: largest tile whose double-buffered logprob block stays
    # under the VMEM budget (safe on v7x's 64 MiB VMEM), capped at 512 rows.
    if tn is None:
        tn = (_VMEM_BUDGET // (2 * tv * dsize)) // row_align * row_align
        tn = max(row_align, min(512, tn))
        tn = min(tn, _round_up(N, row_align))
    assert tn % row_align == 0
    N_pad = _round_up(N, tn)

    logp2 = logprobs.reshape(N, V)
    labels2 = labels.reshape(N).astype(jnp.int32)
    # TODO(synk): pad token id is assumed to be `pad_id` (default 0), matching the
    # canonical NLL subclass; pre-mask it to -1 so the kernel needs one compare.
    labels2 = jnp.where(labels2 == pad_id, -1, labels2)[:, None]  # (N, 1)

    if V_pad != V:
        logp2 = jnp.pad(logp2, ((0, 0), (0, V_pad - V)))
    if N_pad != N:
        logp2 = jnp.pad(logp2, ((0, N_pad - N), (0, 0)))
        labels2 = jnp.pad(labels2, ((0, N_pad - N), (0, 0)), constant_values=-1)

    grid = (N_pad // tn, V_pad // tv)

    vmem_need = (2 * tn * tv * dsize        # double-buffered logprob tile
                 + tn * _LANES * 4          # accumulator scratch
                 + 4 * tn * (4 + 4))        # labels + per-row output buffers
    vmem_limit = int(min(60 * 1024 * 1024,
                         max(16 * 1024 * 1024, vmem_need + (4 << 20))))

    per_row = pl.pallas_call(
        _nll_step_kernel,
        out_shape=jax.ShapeDtypeStruct((N_pad, 1), jnp.float32),
        grid_spec=pltpu.PrefetchScalarGridSpec(
            num_scalar_prefetch=0,
            grid=grid,
            in_specs=[
                pl.BlockSpec((tn, tv), lambda i, k: (i, k)),
                pl.BlockSpec((tn, 1), lambda i, k: (i, 0)),
            ],
            out_specs=pl.BlockSpec((tn, 1), lambda i, k: (i, 0)),
            scratch_shapes=[pltpu.VMEM((tn, _LANES), jnp.float32)],
        ),
        compiler_params=pltpu.CompilerParams(
            dimension_semantics=("parallel", "arbitrary"),
            vmem_limit_bytes=vmem_limit,
        ),
        cost_estimate=pl.CostEstimate(
            flops=2 * N_pad * V_pad,
            transcendentals=0,
            bytes_accessed=N_pad * V_pad * dsize + 2 * N_pad * 4,
        ),
    )(logp2, labels2)

    return jnp.sum(per_row)


class CritBase:
    """JAX mirror of the PyTorch CritBase.forward()."""

    def __init__(self, weights=1.0, batch_mean=True):
        self.keys = ('tgt_word_logprobs', 'tgt_word_labels')
        self.weights = weights
        self.batch_mean = batch_mean

    # TODO(synk): `_step` is abstract (NotImplementedError) in the PyTorch base
    # class; the canonical masked-NLL step is provided here as the Pallas hot path.
    def _step(self, index, src1, src2, *others):
        return nll_step(src1, src2)

    def forward(self, kwargs):
        sources1, sources2, *others = [kwargs[key] for key in self.keys]
        if not isinstance(sources1, list):
            sources1 = [sources1]
        if not isinstance(sources2, list):
            sources2 = [sources2] * len(sources1)
        else:
            assert len(sources1) == len(sources2)
        weights = self.weights
        if not isinstance(weights, list):
            weights = [weights] * len(sources1)
        assert len(sources1) == len(weights)

        dinominator = float(sources1[0].shape[0]) if self.batch_mean else 1.0

        loss = None
        for i, (weight, src1, src2) in enumerate(zip(weights, sources1, sources2)):
            term = weight * self._step(i, src1, src2, *others) / dinominator
            loss = term if loss is None else loss + term
        return (loss, dinominator)


if __name__ == "__main__":
    # Small shapes consistent with the module: batch=2, seq=8, vocab=128
    # (vocab chosen lane-dense so the Pallas path is exercised, not the tiny-V fallback).
    B, T, V = 2, 8, 128
    key = jax.random.PRNGKey(0)
    k_logits, k_labels = jax.random.split(key)

    logits = jax.random.normal(k_logits, (B, T, V), dtype=jnp.float32)
    logprobs = jax.nn.log_softmax(logits, axis=-1)                        # tgt_word_logprobs
    labels = jax.random.randint(k_labels, (B, T), 0, V, dtype=jnp.int32)  # tgt_word_labels (0 = pad)

    crit = CritBase(weights=1.0, batch_mean=True)
    loss, denom = crit.forward({
        'tgt_word_logprobs': logprobs,
        'tgt_word_labels': labels,
    })
    loss = jax.block_until_ready(loss)

    def ref_loss(lp, lb, d):
        onehot = jax.nn.one_hot(lb, lp.shape[-1], dtype=jnp.float32)
        picked = jnp.sum(lp.astype(jnp.float32) * onehot, axis=-1)
        mask = (lb != 0).astype(jnp.float32)
        return -jnp.sum(picked * mask) / d

    ref = ref_loss(logprobs, labels, float(B))
    assert jnp.allclose(loss, ref, rtol=1e-5, atol=1e-5), (loss, ref)

    # Exercise the multi-vocab-tile accumulation path and bf16 inputs with forced tiny tiles.
    V2, T2 = 256, 16
    logits2 = jax.random.normal(jax.random.PRNGKey(1), (B, T2, V2), dtype=jnp.float32)
    lp2 = jax.nn.log_softmax(logits2, axis=-1).astype(jnp.bfloat16)
    lb2 = jax.random.randint(jax.random.PRNGKey(2), (B, T2), 0, V2, dtype=jnp.int32)
    out2 = jax.block_until_ready(nll_step(lp2, lb2, tn=16, tv=128))
    ref2 = ref_loss(lp2.astype(jnp.float32), lb2, 1.0)
    assert jnp.allclose(out2, ref2, rtol=1e-3, atol=1e-3), (out2, ref2)

    print("KERNEL_OK")
</pallas_src>

<mosaic_0001>
module attributes {stable_mosaic.version = 11 : i64} {
  func.func @_nll_step_kernel(%arg0: i32, %arg1: i32, %arg2: memref<16x128xf32, #tpu.memory_space<vmem>>, %arg3: memref<16x1xi32, #tpu.memory_space<vmem>>, %arg4: memref<16x1xf32, #tpu.memory_space<vmem>>, %arg5: memref<16x128xf32, #tpu.memory_space<vmem>>) attributes {dimension_semantics = [#tpu.dimension_semantics<parallel>, #tpu.dimension_semantics<arbitrary>], iteration_bounds = array<i64: 1, 1>, scalar_prefetch = 0 : i64, scratch_operands = 1 : i64, tpu.core_type = #tpu.core_type<tc>, window_params = [{transform_indices = @transform_0, window_bounds = array<i64: 16, 128>}, {transform_indices = @transform_1, window_bounds = array<i64: 16, 1>}, {transform_indices = @transform_2, window_bounds = array<i64: 16, 1>}]} {
    %c0_i32 = arith.constant 0 : i32
    %0 = arith.cmpi eq, %arg1, %c0_i32 : i32
    %1 = arith.extui %0 : i1 to i32
    %c0_i32_0 = arith.constant 0 : i32
    %2 = arith.cmpi ne, %1, %c0_i32_0 : i32
    scf.if %2 {
      %cst_10 = arith.constant 0.000000e+00 : f32
      %19 = vector.broadcast %cst_10 : f32 to vector<16x128xf32>
      %c0_11 = arith.constant 0 : index
      %c0_12 = arith.constant 0 : index
      %20 = vector.load %arg5[%c0_11, %c0_12] : memref<16x128xf32, #tpu.memory_space<vmem>>, vector<16x128xf32>
      tpu.vector_store %arg5[%c0_11, %c0_12], %19 {strides = array<i32>} : memref<16x128xf32, #tpu.memory_space<vmem>>, vector<16x128xf32>,
    } else {
    }
    %c0 = arith.constant 0 : index
    %c0_1 = arith.constant 0 : index
    %3 = vector.load %arg2[%c0, %c0_1] : memref<16x128xf32, #tpu.memory_space<vmem>>, vector<16x128xf32>
    %c0_2 = arith.constant 0 : index
    %c0_3 = arith.constant 0 : index
    %4 = vector.load %arg3[%c0_2, %c0_3] : memref<16x1xi32, #tpu.memory_space<vmem>>, vector<16x1xi32>
    %c128_i32 = arith.constant 128 : i32
    %5 = arith.muli %arg1, %c128_i32 : i32
    %6 = tpu.iota {dimensions = array<i32: 1>} : vector<16x128xi32>
    %7 = vector.broadcast %5 : i32 to vector<16x128xi32>
    %8 = arith.addi %7, %6 : vector<16x128xi32>
    %9 = vector.broadcast %4 : vector<16x1xi32> to vector<16x128xi32>
    %10 = arith.cmpi eq, %8, %9 : vector<16x128xi32>
    %cst = arith.constant 0.000000e+00 : f32
    %11 = vector.broadcast %cst : f32 to vector<16x128xf32>
    %12 = arith.select %10, %3, %11 : vector<16x128xi1>, vector<16x128xf32>
    %c0_4 = arith.constant 0 : index
    %c0_5 = arith.constant 0 : index
    %13 = vector.load %arg5[%c0_4, %c0_5] : memref<16x128xf32, #tpu.memory_space<vmem>>, vector<16x128xf32>
    %14 = arith.addf %13, %12 : vector<16x128xf32>
    %c0_6 = arith.constant 0 : index
    %c0_7 = arith.constant 0 : index
    %15 = vector.load %arg5[%c0_6, %c0_7] : memref<16x128xf32, #tpu.memory_space<vmem>>, vector<16x128xf32>
    tpu.vector_store %arg5[%c0_6, %c0_7], %14 {strides = array<i32>} : memref<16x128xf32, #tpu.memory_space<vmem>>, vector<16x128xf32>,
    %c0_i32_8 = arith.constant 0 : i32
    %16 = arith.cmpi eq, %arg1, %c0_i32_8 : i32
    %17 = arith.extui %16 : i1 to i32
    %c0_i32_9 = arith.constant 0 : i32
    %18 = arith.cmpi ne, %17, %c0_i32_9 : i32
    scf.if %18 {
      %c0_10 = arith.constant 0 : index
      %c0_11 = arith.constant 0 : index
      %19 = vector.load %arg5[%c0_10, %c0_11] : memref<16x128xf32, #tpu.memory_space<vmem>>, vector<16x128xf32>
      %cst_12 = arith.constant dense<0.000000e+00> : vector<16xf32>
      %20 = vector.multi_reduction <add>, %19, %cst_12 [1] : vector<16x128xf32> to vector<16xf32>
      %21 = vector.shape_cast %20 : vector<16xf32> to vector<16x1xf32>
      %cst_13 = arith.constant 0.000000e+00 : f32
      %22 = vector.broadcast %cst_13 : f32 to vector<16x1xf32>
      %23 = arith.subf %22, %21 : vector<16x1xf32>
      %c0_14 = arith.constant 0 : index
      %c0_15 = arith.constant 0 : index
      %24 = vector.load %arg4[%c0_14, %c0_15] : memref<16x1xf32, #tpu.memory_space<vmem>>, vector<16x1xf32>
      tpu.vector_store %arg4[%c0_14, %c0_15], %23 {strides = array<i32>} : memref<16x1xf32, #tpu.memory_space<vmem>>, vector<16x1xf32>,
    } else {
    }
    return
  }
  func.func @transform_0(%arg0: i32, %arg1: i32) -> (i32, i32) {
    %c0_i32 = arith.constant 0 : i32
    return %arg0, %arg1 : i32, i32
  }
  func.func @transform_1(%arg0: i32, %arg1: i32) -> (i32, i32) {
    %c0_i32 = arith.constant 0 : i32
    %c0_i32_0 = arith.constant 0 : i32
    return %arg0, %c0_i32 : i32, i32
  }
  func.func @transform_2(%arg0: i32, %arg1: i32) -> (i32, i32) {
    %c0_i32 = arith.constant 0 : i32
    %c0_i32_0 = arith.constant 0 : i32
    return %arg0, %c0_i32 : i32, i32
  }
}

</mosaic_0001>

<bundles_post_ra>
// kernel: tpu_custom_call.1
= control target key start
LH: loop header
LB: loop body
LE: loop exit
PB: predicated region body
PF: predicated region fallthrough
CT: control target
= control target key end

     0   :  { %v62_v0 = vmov 0   ;;  %v22_v3 = vlaneseq  ;;  %vm53_vm2 = vcmask 7168   ;;  %s96_s1 = inlined_call_operand.vmem [shape: s32[16,1], index: 1, kind: input, shape index: {}]   ;;  %s97_s0 = inlined_call_operand.vmem [shape: f32[16,128], index: 0, kind: input, shape index: {}]   ;;  %s98_s2 = inlined_call_operand.vmem [shape: f32[16,1], index: 2, kind: output, shape index: {}]  }
   0x1   :  { %61 = vset.pattern.permute.xlu0 %v62_v0  ;;  %v19_v1 = vld [vmem:[%s96_s1] sm:$0xff]  ;;  %v20_v2 = vld [vmem:[%s96_s1 + $0x8] sm:$0xff] }
   0x2   :  { %27 = vperm.xlu0 %61, %v19_v1   ;;  %v23_v4 = vand.u32 127, %v22_v3  ;;  %v17_v5 = vld [vmem:[%s97_s0] sm:$0xff]  ;;  %v18_v8 = vld [vmem:[%s97_s0 + $0x8] sm:$0xff] }
   0x6   :  { %30 = vperm.xlu0 %61, %v20_v2  }
  0x81   :  { %v28_v6 = vpop.permute.xlu0 %27 }
  0x82   :  { %vm32_vm0 = vcmp.eq.s32.totalorder %v23_v4, %v28_v6 }
  0x83   :  { %v34_v7 = vsel %vm32_vm0, %v17_v5, 0.0 }
  0x84   :  { %47 = vadd.xlane.f32.xlu1 %v34_v7 }
  0x85   :  { %v31_v9 = vpop.permute.xlu0 %30 }
  0x86   :  { %vm33_vm1 = vcmp.eq.s32.totalorder %v23_v4, %v31_v9 }
  0x87   :  { %v35_v10 = vsel %vm33_vm1, %v18_v8, 0.0 }
  0x88   :  { %49 = vadd.xlane.f32.xlu1 %v35_v10 }
 0x111   :  { %v48_v11 = vpop.xlane.xlu1 %47 }
 0x112   :  { %v51_v12 = vsub.f32 0.0, %v48_v11 }
 0x114   :  { %54 = vst.msk [vmem:[%s98_s2] sm:$0xff] %vm53_vm2, %v51_v12 }
 0x115   :  { %v50_v13 = vpop.xlane.xlu1 %49 }
 0x116   :  { %v52_v14 = vsub.f32 0.0, %v50_v13 }
 0x118   :  { %55 = vst.msk [vmem:[%s98_s2 + $0x8] sm:$0xff] %vm53_vm2, %v52_v14 }

</bundles_post_ra>
